<compile_context>
chip_gen: v5e
topology: v5e:2x2
jax: 0.10.0
libtpu: 0.0.40
codegen_flags: <defaults>
</compile_context>

<pallas_src>
import jax
import jax.numpy as jnp
from jax.experimental import pallas as pl
from jax.experimental.pallas import tpu as pltpu

ALPHA = 2.5  # deterministic constructor arg for Multiplier(alpha)

_LANE = 128
_SMALL_ELEMS = 64 * 1024               # below this, XLA fused multiply wins
_TARGET_BLOCK_BYTES = 2 * 1024 * 1024  # ~2 MiB per block buffer


def _scale_kernel(x_ref, o_ref, *, alpha):
    # elementwise hot path: o = x * alpha (VPU)
    o_ref[...] = x_ref[...] * alpha


def _choose_width(n):
    # Widest lane-dense last dim that evenly divides n (multiple of 128).
    for w in (8192, 4096, 2048, 1024, 512, 256, _LANE):
        if n % w == 0:
            return w
    return None


def _choose_block_rows(rows, row_bytes):
    # Target ~2 MiB per block; multiple of 32 rows so the sublane tile is
    # legal for any dtype packing when we actually tile the row dim.
    target = max(32, _TARGET_BLOCK_BYTES // row_bytes)
    target = (target // 32) * 32
    if rows <= target:
        if rows >= 64:
            # Keep grid >= 2 so v7x megacore uses both TensorCores.
            half = ((-(-rows // 2)) + 31) // 32 * 32
            if half < rows:
                return half
        return rows  # full-extent block is always a legal tile
    return target


def multiplier(x: jax.Array, alpha: float = ALPHA) -> jax.Array:
    # Match torch promotion: int * python float -> float.
    if jnp.issubdtype(x.dtype, jnp.integer) or x.dtype == jnp.bool_:
        x = x.astype(jnp.float32)

    n = x.size
    width = _choose_width(n)
    if n < _SMALL_ELEMS or width is None:
        # Tiny or ragged (n % 128 != 0) sizes: plain XLA multiply — a
        # pallas_call plus pad/slice would only add overhead and HBM traffic.
        return x * alpha

    # Lane-dense 2D slab; contiguous reshape is a free metadata op (no copy).
    slab = x.reshape(n // width, width)
    rows = slab.shape[0]
    row_bytes = width * slab.dtype.itemsize
    block_rows = _choose_block_rows(rows, row_bytes)
    grid = (pl.cdiv(rows, block_rows),)  # ragged edge block is auto-masked

    out = pl.pallas_call(
        lambda x_ref, o_ref: _scale_kernel(x_ref, o_ref, alpha=alpha),
        out_shape=jax.ShapeDtypeStruct(slab.shape, slab.dtype),
        grid=grid,
        in_specs=[pl.BlockSpec((block_rows, width), lambda i: (i, 0))],
        out_specs=pl.BlockSpec((block_rows, width), lambda i: (i, 0)),
        compiler_params=pltpu.CompilerParams(
            dimension_semantics=("parallel",),
        ),
        cost_estimate=pl.CostEstimate(
            flops=n,
            transcendentals=0,
            bytes_accessed=2 * n * slab.dtype.itemsize,
        ),
    )(slab)

    return out.reshape(x.shape)


if __name__ == "__main__":
    key = jax.random.PRNGKey(0)
    k1, k2 = jax.random.split(key)

    # Small NCHW tensor matching the module's typical use (fast path).
    x_small = jax.random.normal(k1, (2, 4, 16, 16), dtype=jnp.float32)
    y_small = jax.block_until_ready(multiplier(x_small, ALPHA))
    assert y_small.shape == x_small.shape and y_small.dtype == x_small.dtype
    assert jnp.allclose(y_small, x_small * ALPHA, atol=1e-6, rtol=1e-6)

    # Larger tensor exercising the Pallas path (wide slab, grid >= 2).
    x_big = jax.random.normal(k2, (4, 32, 64, 64), dtype=jnp.float32)
    y_big = jax.block_until_ready(multiplier(x_big, ALPHA))
    assert y_big.shape == x_big.shape and y_big.dtype == x_big.dtype
    assert jnp.allclose(y_big, x_big * ALPHA, atol=1e-6, rtol=1e-6)

    print("KERNEL_OK")
</pallas_src>

<mosaic_0001>
module attributes {stable_mosaic.version = 11 : i64} {
  func.func @_lambda_(%arg0: i32, %arg1: memref<32x8192xf32, #tpu.memory_space<vmem>>, %arg2: memref<32x8192xf32, #tpu.memory_space<vmem>>) attributes {dimension_semantics = [#tpu.dimension_semantics<parallel>], iteration_bounds = array<i64: 2>, scalar_prefetch = 0 : i64, scratch_operands = 0 : i64, tpu.core_type = #tpu.core_type<tc>, window_params = [{transform_indices = @transform_0, window_bounds = array<i64: 32, 8192>}, {transform_indices = @transform_1, window_bounds = array<i64: 32, 8192>}]} {
    %c0 = arith.constant 0 : index
    %c0_0 = arith.constant 0 : index
    %0 = vector.load %arg1[%c0, %c0_0] : memref<32x8192xf32, #tpu.memory_space<vmem>>, vector<32x8192xf32>
    %cst = arith.constant 2.500000e+00 : f32
    %1 = vector.broadcast %cst : f32 to vector<32x8192xf32>
    %2 = arith.mulf %0, %1 : vector<32x8192xf32>
    %c0_1 = arith.constant 0 : index
    %c0_2 = arith.constant 0 : index
    %3 = vector.load %arg2[%c0_1, %c0_2] : memref<32x8192xf32, #tpu.memory_space<vmem>>, vector<32x8192xf32>
    tpu.vector_store %arg2[%c0_1, %c0_2], %2 {strides = array<i32>} : memref<32x8192xf32, #tpu.memory_space<vmem>>, vector<32x8192xf32>,
    return
  }
  func.func @transform_0(%arg0: i32) -> (i32, i32) {
    %c0_i32 = arith.constant 0 : i32
    %c0_i32_0 = arith.constant 0 : i32
    return %arg0, %c0_i32 : i32, i32
  }
  func.func @transform_1(%arg0: i32) -> (i32, i32) {
    %c0_i32 = arith.constant 0 : i32
    %c0_i32_0 = arith.constant 0 : i32
    return %arg0, %c0_i32 : i32, i32
  }
}

</mosaic_0001>

<bundles_post_ra>
// kernel: tpu_custom_call.1
= control target key start
LH: loop header
LB: loop body
LE: loop exit
PB: predicated region body
PF: predicated region fallthrough
CT: control target
= control target key end

     0   :  { %6 = vsyncpa [#allocation3], 0  ;;  %s1824_s0 = inlined_call_operand.hbm [shape: f32[64,8192], index: 0, kind: input, shape index: {}]   ;;  %s1825_s1 = inlined_call_operand.hbm [shape: f32[64,8192], index: 1, kind: output, shape index: {}]  }
   0x1   :  { %8 = vsyncpa [#allocation3 + $0x1], 0 }
   0x2   :  { %9 = vsyncpa [#allocation4], 0 }
   0x3   :  { %11 = vsyncpa [#allocation4 + $0x1], 0  ;;  %s1180_s6 = smov 0   ;;  %s1182_s7 = smov 0  }
   0x4   :  { %s1184_s8 = smov 0   ;;  %s1186_s9 = smov 0  }
   0x5 LB: > { %s1201_s10 = sadd.s32 4294967295, %s1164_s9   ;;  %s998_s11 = sadd.s32 4294967294, %s1164_s9   ;;  %s1164_s9 = sphi %s1186_s9, %s1835_s9   ;;  %s1160_s8 = sphi %s1184_s8, %s1834_s8   ;;  %s1156_s7 = sphi %s1182_s7, %s1833_s7   ;;  %s1152_s6 = sphi %s1180_s6, %s1832_s6  }
   0x6   : > { %s1205_s12 = sadd.s32 1, %s1164_s9   ;;  %s24_s13 = sadd.s32 1, %s1160_s8 }
   0x7   : > { %s21_s14 = ssub.s32 %s1164_s9, %s1205_s12  ;;  %p31_p0 = scmp.ne.s32.totalorder %s1160_s8, %s1156_s7 }
   0x8   : > { %p22_p1 = scmp.eq.s32.totalorder %s21_s14, 0  ;;  %p32_p2 = scmp.eq.s32.totalorder %s1164_s9, 0 }
   0x9   : > { %p37_p3 = scmp.ne.s32.totalorder %s1156_s7, %s1152_s6  ;;  %p38_p4 = scmp.eq.s32.totalorder %s1201_s10, 0 }
   0xa   : > { %s1217_s15 = scalar_select %p22_p1, %s1160_s8, %s24_s13  }
   0xb   : > { %p1219_p5 = por %p32_p2, %p31_p0  ;;  %p1223_p6 = por %p38_p4, %p37_p3 }
   0xc   : > { %p61_p7 = scmp.eq.s32.totalorder %s1201_s10, 1  ;;  %p67_p8 = scmp.eq.s32.totalorder %s998_s11, 1 }
   0xd   : > { %p1030_p10 = scmp.lt.s32.totalorder %s1164_s9, 2  ;;  %s87_s20 = sand.u32 1, %s1160_s8  }
   0xe   : > { %p1230_p11 = por %p61_p7, %p31_p0  ;;  %p1234_p12 = por %p67_p8, %p37_p3 }
   0xf   : > { %s1015_s21 = sshll.u32 %s1164_s9, 11  ;;  %s1001_s22 = sshll.u32 %s87_s20, 11 }
  0x10   : > { %s97_s25 = scalar_lea.hbm %s1824_s0, %s1015_s21  ;;  %s91_s27 = scalar_lea.vmem [#allocation2], %s1001_s22 }
  0x11   : > { %s98_s26 = sshll.u32 %s97_s25, 4  ;;  %s100_s28 = sshll.u32 %s91_s27, 4  ;;  %s99_s26 = int_to_ptr.hbm [resolvable:$true] %s98_s26  ;;  %s101_s28 = int_to_ptr.vmem [resolvable:$true] %s100_s28 }
  0x12   : > { %p1245_p13 = pnand %p1030_p10, %p1219_p5  ;;  %p1005_p0 = scmp.ge.s32.totalorder %s1164_s9, 1 }
  0x13   : > { %p108_p1 = scmp.lt.s32.totalorder %s1164_s9, 3  ;;  %s88_s30 = scalar_lea.sflag [#allocation3], %s87_s20 }
  0x14   : > { %s1068_s2 = sshra.s32 %s99_s26, 4  ;;  %p1072_p3 = pneg %p1245_p13  ;;  %s1069_s2 = int_to_ptr.hbm [resolvable:$true] %s1068_s2 }
  0x15   : > { %s1070_s3 = scalar_lea.hbm %s1069_s2, 2048  ;;  %s1075_s11 = scalar_lea.hbm %s1824_s0, 4096 }
  0x16   : > { %p1071_p2 = scmp.ne.s32.totalorder %s1069_s2, %s1070_s3  ;;  %p1076_p5 = scmp.lt.s32.totalorder %s1069_s2, %s1824_s0 }
  0x17   : > { %p1077_p8 = scmp.lt.s32.totalorder %s1075_s11, %s1070_s3 }
  0x18   : > { %p1073_p4 = pnand %p1072_p3, %p1071_p2 }
  0x19   : > { %p1078_p10 = por %p1077_p8, %p1076_p5 }
  0x1a   : > { %p1074_p7 = pneg %p1073_p4 }
  0x1c   : > { %p1079_p9 = pnand %p1078_p10, %p1074_p7 }
  0x1e   : > { %1082 = shalt.err (!%p1079_p9)
}
  0x1f   : > { %s1166_s16 = smov 8192   ;;  %s1167_s20 = smov 512  }
  0x20   : > { %1025 = dma.hbm_to_vmem [thread:$0]  (!%p1245_p13), %s99_s26, 32768, %s101_s28, %s88_s30, %s1166_s16, %s1166_s16, %s1167_s20  }
  0x21   : > { %p109_p2 = pnand %p1005_p0, %p108_p1 }
  0x22   : > { %s1266_s21 = sand.u32 (!%p109_p2), 1, %s1156_s7  }
  0x23   : > { %112 = sbr.rel (%p109_p2) target bundleno = 303 (0x12f), region = 24  ;;  %s1006_s22 = sshll.u32 (!%p109_p2), %s1266_s21, 11 }
  0x24   : > { %s115_s23 = scalar_lea.sflag (!%p109_p2), [#allocation3], %s1266_s21  ;;  %s1270_s24 = scalar_lea.vmem (!%p109_p2), [#allocation2], %s1006_s22 }
  0x28   : > { %1143 = dma.done.wait (%p1223_p6), %s115_s23, 32768  }
  0x29   : > { %1145 = vsyncadd (%p1223_p6), %s115_s23, 4294934528  ;;  %v140_v0 = vld [vmem:[%s1270_s24] sm:$0xff]  ;;  %v141_v1 = vld [vmem:[%s1270_s24 + $0x8] sm:$0xff]  ;;  %s1283_s17 = scalar_lea.vmem [#allocation5], %s1006_s22  ;;  %s1017_s25 = sshll.u32 %s1201_s10, 11 }
  0x2a   : > { %v142_v2 = vld [vmem:[%s1270_s24 + $0x10] sm:$0xff]  ;;  %v396_v3 = vmul.f32 2.5, %v140_v0  ;;  %v397_v4 = vmul.f32 2.5, %v141_v1  ;;  %v143_v6 = vld [vmem:[%s1270_s24 + $0x18] sm:$0xff]  ;;  %v144_v7 = vld [vmem:[%s1270_s24 + $0x20] sm:$0xff]  ;;  %s921_s28 = scalar_lea.hbm %s1825_s1, %s1017_s25  ;;  %s922_s10 = sshll.u32 %s1283_s17, 4  ;;  %s923_s10 = int_to_ptr.vmem [resolvable:$true] %s922_s10 }
  0x2b   : > { %v398_v5 = vmul.f32 2.5, %v142_v2  ;;  %v145_v8 = vld [vmem:[%s1270_s24 + $0x28] sm:$0xff]  ;;  %v399_v9 = vmul.f32 2.5, %v143_v6  ;;  %v146_v10 = vld [vmem:[%s1270_s24 + $0x30] sm:$0xff]  ;;  %v400_v11 = vmul.f32 2.5, %v144_v7  ;;  %v147_v12 = vld [vmem:[%s1270_s24 + $0x38] sm:$0xff] }
  0x2c   : > { %652 = vst [vmem:[%s1283_s17] sm:$0xff] %v396_v3  ;;  %v401_v13 = vmul.f32 2.5, %v145_v8  ;;  %v148_v14 = vld [vmem:[%s1270_s24 + $0x40] sm:$0xff]  ;;  %v402_v15 = vmul.f32 2.5, %v146_v10  ;;  %v149_v16 = vld [vmem:[%s1270_s24 + $0x48] sm:$0xff]  ;;  %v403_v17 = vmul.f32 2.5, %v147_v12  ;;  %v150_v18 = vld [vmem:[%s1270_s24 + $0x50] sm:$0xff] }
  0x2d   : > { %653 = vst [vmem:[%s1283_s17 + $0x8] sm:$0xff] %v397_v4  ;;  %v404_v19 = vmul.f32 2.5, %v148_v14  ;;  %v151_v20 = vld [vmem:[%s1270_s24 + $0x58] sm:$0xff]  ;;  %v405_v21 = vmul.f32 2.5, %v149_v16  ;;  %v152_v22 = vld [vmem:[%s1270_s24 + $0x60] sm:$0xff]  ;;  %v406_v23 = vmul.f32 2.5, %v150_v18 }
  0x2e   : > { %654 = vst [vmem:[%s1283_s17 + $0x10] sm:$0xff] %v398_v5  ;;  %v153_v24 = vld [vmem:[%s1270_s24 + $0x68] sm:$0xff]  ;;  %v407_v25 = vmul.f32 2.5, %v151_v20  ;;  %v154_v26 = vld [vmem:[%s1270_s24 + $0x70] sm:$0xff]  ;;  %v408_v27 = vmul.f32 2.5, %v152_v22  ;;  %v155_v28 = vld [vmem:[%s1270_s24 + $0x78] sm:$0xff] }
  0x2f   : > { %655 = vst [vmem:[%s1283_s17 + $0x18] sm:$0xff] %v399_v9  ;;  %v409_v29 = vmul.f32 2.5, %v153_v24  ;;  %v156_v30 = vld [vmem:[%s1270_s24 + $0x80] sm:$0xff]  ;;  %v410_v31 = vmul.f32 2.5, %v154_v26  ;;  %v157_v32 = vld [vmem:[%s1270_s24 + $0x88] sm:$0xff]  ;;  %v411_v33 = vmul.f32 2.5, %v155_v28 }
  0x30   : > { %656 = vst [vmem:[%s1283_s17 + $0x20] sm:$0xff] %v400_v11  ;;  %v158_v34 = vld [vmem:[%s1270_s24 + $0x90] sm:$0xff]  ;;  %v412_v35 = vmul.f32 2.5, %v156_v30  ;;  %v159_v36 = vld [vmem:[%s1270_s24 + $0x98] sm:$0xff]  ;;  %v413_v37 = vmul.f32 2.5, %v157_v32  ;;  %v160_v38 = vld [vmem:[%s1270_s24 + $0xa0] sm:$0xff] }
  0x31   : > { %657 = vst [vmem:[%s1283_s17 + $0x28] sm:$0xff] %v401_v13  ;;  %v414_v39 = vmul.f32 2.5, %v158_v34  ;;  %v161_v40 = vld [vmem:[%s1270_s24 + $0xa8] sm:$0xff]  ;;  %v415_v41 = vmul.f32 2.5, %v159_v36  ;;  %v162_v42 = vld [vmem:[%s1270_s24 + $0xb0] sm:$0xff]  ;;  %v416_v43 = vmul.f32 2.5, %v160_v38 }
  0x32   : > { %658 = vst [vmem:[%s1283_s17 + $0x30] sm:$0xff] %v402_v15  ;;  %v163_v44 = vld [vmem:[%s1270_s24 + $0xb8] sm:$0xff]  ;;  %v417_v45 = vmul.f32 2.5, %v161_v40  ;;  %v164_v46 = vld [vmem:[%s1270_s24 + $0xc0] sm:$0xff]  ;;  %v418_v47 = vmul.f32 2.5, %v162_v42  ;;  %v165_v48 = vld [vmem:[%s1270_s24 + $0xc8] sm:$0xff] }
  0x33   : > { %659 = vst [vmem:[%s1283_s17 + $0x38] sm:$0xff] %v403_v17  ;;  %v419_v49 = vmul.f32 2.5, %v163_v44  ;;  %v166_v50 = vld [vmem:[%s1270_s24 + $0xd0] sm:$0xff]  ;;  %v420_v51 = vmul.f32 2.5, %v164_v46  ;;  %v167_v52 = vld [vmem:[%s1270_s24 + $0xd8] sm:$0xff]  ;;  %v421_v53 = vmul.f32 2.5, %v165_v48 }
  0x34   : > { %660 = vst [vmem:[%s1283_s17 + $0x40] sm:$0xff] %v404_v19  ;;  %v168_v54 = vld [vmem:[%s1270_s24 + $0xe0] sm:$0xff]  ;;  %v422_v55 = vmul.f32 2.5, %v166_v50  ;;  %v169_v56 = vld [vmem:[%s1270_s24 + $0xe8] sm:$0xff]  ;;  %v423_v57 = vmul.f32 2.5, %v167_v52  ;;  %v170_v58 = vld [vmem:[%s1270_s24 + $0xf0] sm:$0xff] }
  0x35   : > { %661 = vst [vmem:[%s1283_s17 + $0x48] sm:$0xff] %v405_v21  ;;  %v424_v59 = vmul.f32 2.5, %v168_v54  ;;  %v171_v60 = vld [vmem:[%s1270_s24 + $0xf8] sm:$0xff]  ;;  %v425_v61 = vmul.f32 2.5, %v169_v56  ;;  %v172_v62 = vld [vmem:[%s1270_s24 + $0x100] sm:$0xff]  ;;  %v426_v63 = vmul.f32 2.5, %v170_v58 }
  0x36   : > { %662 = vst [vmem:[%s1283_s17 + $0x50] sm:$0xff] %v406_v23  ;;  %v173_v0 = vld [vmem:[%s1270_s24 + $0x108] sm:$0xff]  ;;  %v427_v1 = vmul.f32 2.5, %v171_v60  ;;  %v174_v2 = vld [vmem:[%s1270_s24 + $0x110] sm:$0xff]  ;;  %v428_v3 = vmul.f32 2.5, %v172_v62  ;;  %v175_v4 = vld [vmem:[%s1270_s24 + $0x118] sm:$0xff] }
  0x37   : > { %663 = vst [vmem:[%s1283_s17 + $0x58] sm:$0xff] %v407_v25  ;;  %v429_v5 = vmul.f32 2.5, %v173_v0  ;;  %v176_v6 = vld [vmem:[%s1270_s24 + $0x120] sm:$0xff]  ;;  %v430_v7 = vmul.f32 2.5, %v174_v2  ;;  %v177_v8 = vld [vmem:[%s1270_s24 + $0x128] sm:$0xff]  ;;  %v431_v9 = vmul.f32 2.5, %v175_v4 }
  0x38   : > { %664 = vst [vmem:[%s1283_s17 + $0x60] sm:$0xff] %v408_v27  ;;  %v178_v10 = vld [vmem:[%s1270_s24 + $0x130] sm:$0xff]  ;;  %v432_v11 = vmul.f32 2.5, %v176_v6  ;;  %v179_v12 = vld [vmem:[%s1270_s24 + $0x138] sm:$0xff]  ;;  %v433_v13 = vmul.f32 2.5, %v177_v8  ;;  %v180_v14 = vld [vmem:[%s1270_s24 + $0x140] sm:$0xff] }
  0x39   : > { %665 = vst [vmem:[%s1283_s17 + $0x68] sm:$0xff] %v409_v29  ;;  %v434_v15 = vmul.f32 2.5, %v178_v10  ;;  %v181_v16 = vld [vmem:[%s1270_s24 + $0x148] sm:$0xff]  ;;  %v435_v17 = vmul.f32 2.5, %v179_v12  ;;  %v182_v18 = vld [vmem:[%s1270_s24 + $0x150] sm:$0xff]  ;;  %v436_v19 = vmul.f32 2.5, %v180_v14 }
  0x3a   : > { %666 = vst [vmem:[%s1283_s17 + $0x70] sm:$0xff] %v410_v31  ;;  %v183_v20 = vld [vmem:[%s1270_s24 + $0x158] sm:$0xff]  ;;  %v437_v21 = vmul.f32 2.5, %v181_v16  ;;  %v184_v22 = vld [vmem:[%s1270_s24 + $0x160] sm:$0xff]  ;;  %v438_v23 = vmul.f32 2.5, %v182_v18  ;;  %v185_v24 = vld [vmem:[%s1270_s24 + $0x168] sm:$0xff] }
  0x3b   : > { %667 = vst [vmem:[%s1283_s17 + $0x78] sm:$0xff] %v411_v33  ;;  %v439_v25 = vmul.f32 2.5, %v183_v20  ;;  %v186_v26 = vld [vmem:[%s1270_s24 + $0x170] sm:$0xff]  ;;  %v440_v27 = vmul.f32 2.5, %v184_v22  ;;  %v187_v28 = vld [vmem:[%s1270_s24 + $0x178] sm:$0xff]  ;;  %v441_v29 = vmul.f32 2.5, %v185_v24 }
  0x3c   : > { %668 = vst [vmem:[%s1283_s17 + $0x80] sm:$0xff] %v412_v35  ;;  %v188_v30 = vld [vmem:[%s1270_s24 + $0x180] sm:$0xff]  ;;  %v442_v31 = vmul.f32 2.5, %v186_v26  ;;  %v189_v32 = vld [vmem:[%s1270_s24 + $0x188] sm:$0xff]  ;;  %v443_v33 = vmul.f32 2.5, %v187_v28  ;;  %v190_v34 = vld [vmem:[%s1270_s24 + $0x190] sm:$0xff] }
  0x3d   : > { %669 = vst [vmem:[%s1283_s17 + $0x88] sm:$0xff] %v413_v37  ;;  %v444_v35 = vmul.f32 2.5, %v188_v30  ;;  %v191_v36 = vld [vmem:[%s1270_s24 + $0x198] sm:$0xff]  ;;  %v445_v37 = vmul.f32 2.5, %v189_v32  ;;  %v192_v38 = vld [vmem:[%s1270_s24 + $0x1a0] sm:$0xff]  ;;  %v193_v40 = vld [vmem:[%s1270_s24 + $0x1a8] sm:$0xff] }
  0x3e   : > { %670 = vst [vmem:[%s1283_s17 + $0x90] sm:$0xff] %v414_v39  ;;  %v446_v39 = vmul.f32 2.5, %v190_v34  ;;  %v194_v42 = vld [vmem:[%s1270_s24 + $0x1b0] sm:$0xff]  ;;  %v195_v44 = vld [vmem:[%s1270_s24 + $0x1b8] sm:$0xff]  ;;  %v196_v46 = vld [vmem:[%s1270_s24 + $0x1c0] sm:$0xff]  ;;  %s924_s29 = sshll.u32 %s921_s28, 4  ;;  %s925_s29 = int_to_ptr.hbm [resolvable:$true] %s924_s29 }
  0x3f   : > { %671 = vst [vmem:[%s1283_s17 + $0x98] sm:$0xff] %v415_v41  ;;  %v447_v41 = vmul.f32 2.5, %v191_v36  ;;  %v197_v48 = vld [vmem:[%s1270_s24 + $0x1c8] sm:$0xff]  ;;  %v198_v50 = vld [vmem:[%s1270_s24 + $0x1d0] sm:$0xff]  ;;  %v199_v52 = vld [vmem:[%s1270_s24 + $0x1d8] sm:$0xff]  ;;  %s909_s30 = scalar_lea.sflag [#allocation4], %s1266_s21 }
  0x40   : > { %672 = vst [vmem:[%s1283_s17 + $0xa0] sm:$0xff] %v416_v43  ;;  %v448_v43 = vmul.f32 2.5, %v192_v38  ;;  %v200_v54 = vld [vmem:[%s1270_s24 + $0x1e0] sm:$0xff]  ;;  %v201_v56 = vld [vmem:[%s1270_s24 + $0x1e8] sm:$0xff]  ;;  %v202_v58 = vld [vmem:[%s1270_s24 + $0x1f0] sm:$0xff]  ;;  %s1112_s2 = sshra.s32 %s925_s29, 4  ;;  %s1113_s2 = int_to_ptr.hbm [resolvable:$true] %s1112_s2 }
  0x41   : > { %673 = vst [vmem:[%s1283_s17 + $0xa8] sm:$0xff] %v417_v45  ;;  %v449_v45 = vmul.f32 2.5, %v193_v40  ;;  %v203_v60 = vld [vmem:[%s1270_s24 + $0x1f8] sm:$0xff]  ;;  %v204_v62 = vld [vmem:[%s1270_s24 + $0x200] sm:$0xff]  ;;  %v205_v0 = vld [vmem:[%s1270_s24 + $0x208] sm:$0xff]  ;;  %s1114_s3 = scalar_lea.hbm %s1113_s2, 2048  ;;  %p1119_p0 = scmp.lt.s32.totalorder %s1113_s2, %s1825_s1 }
  0x42   : > { %674 = vst [vmem:[%s1283_s17 + $0xb0] sm:$0xff] %v418_v47  ;;  %v450_v47 = vmul.f32 2.5, %v194_v42  ;;  %v206_v2 = vld [vmem:[%s1270_s24 + $0x210] sm:$0xff]  ;;  %v207_v4 = vld [vmem:[%s1270_s24 + $0x218] sm:$0xff]  ;;  %v208_v6 = vld [vmem:[%s1270_s24 + $0x220] sm:$0xff]  ;;  %p1115_p6 = scmp.ne.s32.totalorder %s1113_s2, %s1114_s3  ;;  %s1118_s11 = scalar_lea.hbm %s1825_s1, 4096 }
  0x43   : > { %675 = vst [vmem:[%s1283_s17 + $0xb8] sm:$0xff] %v419_v49  ;;  %v451_v49 = vmul.f32 2.5, %v195_v44  ;;  %v209_v8 = vld [vmem:[%s1270_s24 + $0x228] sm:$0xff]  ;;  %v210_v10 = vld [vmem:[%s1270_s24 + $0x230] sm:$0xff]  ;;  %v211_v12 = vld [vmem:[%s1270_s24 + $0x238] sm:$0xff]  ;;  %p1120_p1 = scmp.lt.s32.totalorder %s1118_s11, %s1114_s3 }
  0x44   : > { %676 = vst [vmem:[%s1283_s17 + $0xc0] sm:$0xff] %v420_v51  ;;  %v452_v51 = vmul.f32 2.5, %v196_v46  ;;  %v212_v14 = vld [vmem:[%s1270_s24 + $0x240] sm:$0xff]  ;;  %v213_v16 = vld [vmem:[%s1270_s24 + $0x248] sm:$0xff]  ;;  %v214_v18 = vld [vmem:[%s1270_s24 + $0x250] sm:$0xff]  ;;  %p1116_p9 = pnand %p1115_p6, %p1230_p11 }
  0x45   : > { %677 = vst [vmem:[%s1283_s17 + $0xc8] sm:$0xff] %v421_v53  ;;  %v453_v53 = vmul.f32 2.5, %v197_v48  ;;  %v215_v20 = vld [vmem:[%s1270_s24 + $0x258] sm:$0xff]  ;;  %v216_v22 = vld [vmem:[%s1270_s24 + $0x260] sm:$0xff]  ;;  %v217_v24 = vld [vmem:[%s1270_s24 + $0x268] sm:$0xff]  ;;  %p1121_p3 = por %p1120_p1, %p1119_p0 }
  0x46   : > { %678 = vst [vmem:[%s1283_s17 + $0xd0] sm:$0xff] %v422_v55  ;;  %v454_v55 = vmul.f32 2.5, %v198_v50  ;;  %v218_v26 = vld [vmem:[%s1270_s24 + $0x270] sm:$0xff]  ;;  %v219_v28 = vld [vmem:[%s1270_s24 + $0x278] sm:$0xff]  ;;  %v220_v30 = vld [vmem:[%s1270_s24 + $0x280] sm:$0xff]  ;;  %p1117_p13 = pneg %p1116_p9 }
  0x47   : > { %679 = vst [vmem:[%s1283_s17 + $0xd8] sm:$0xff] %v423_v57  ;;  %v455_v57 = vmul.f32 2.5, %v199_v52  ;;  %v221_v32 = vld [vmem:[%s1270_s24 + $0x288] sm:$0xff]  ;;  %v222_v34 = vld [vmem:[%s1270_s24 + $0x290] sm:$0xff]  ;;  %v223_v36 = vld [vmem:[%s1270_s24 + $0x298] sm:$0xff] }
  0x48   : > { %680 = vst [vmem:[%s1283_s17 + $0xe0] sm:$0xff] %v424_v59  ;;  %v456_v59 = vmul.f32 2.5, %v200_v54  ;;  %v224_v38 = vld [vmem:[%s1270_s24 + $0x2a0] sm:$0xff]  ;;  %v225_v40 = vld [vmem:[%s1270_s24 + $0x2a8] sm:$0xff]  ;;  %v226_v42 = vld [vmem:[%s1270_s24 + $0x2b0] sm:$0xff]  ;;  %p1122_p4 = pnand %p1121_p3, %p1117_p13 }
  0x49   : > { %681 = vst [vmem:[%s1283_s17 + $0xe8] sm:$0xff] %v425_v61  ;;  %v457_v61 = vmul.f32 2.5, %v201_v56  ;;  %v227_v44 = vld [vmem:[%s1270_s24 + $0x2b8] sm:$0xff]  ;;  %v228_v46 = vld [vmem:[%s1270_s24 + $0x2c0] sm:$0xff]  ;;  %v229_v48 = vld [vmem:[%s1270_s24 + $0x2c8] sm:$0xff] }
  0x4a   : > { %682 = vst [vmem:[%s1283_s17 + $0xf0] sm:$0xff] %v426_v63  ;;  %v458_v63 = vmul.f32 2.5, %v202_v58  ;;  %v230_v50 = vld [vmem:[%s1270_s24 + $0x2d0] sm:$0xff]  ;;  %v231_v52 = vld [vmem:[%s1270_s24 + $0x2d8] sm:$0xff]  ;;  %v232_v54 = vld [vmem:[%s1270_s24 + $0x2e0] sm:$0xff] }
  0x4b   : > { %683 = vst [vmem:[%s1283_s17 + $0xf8] sm:$0xff] %v427_v1  ;;  %v459_v1 = vmul.f32 2.5, %v203_v60  ;;  %v233_v56 = vld [vmem:[%s1270_s24 + $0x2e8] sm:$0xff]  ;;  %v234_v58 = vld [vmem:[%s1270_s24 + $0x2f0] sm:$0xff]  ;;  %v235_v60 = vld [vmem:[%s1270_s24 + $0x2f8] sm:$0xff] }
  0x4c   : > { %684 = vst [vmem:[%s1283_s17 + $0x100] sm:$0xff] %v428_v3  ;;  %v460_v3 = vmul.f32 2.5, %v204_v62  ;;  %v236_v62 = vld [vmem:[%s1270_s24 + $0x300] sm:$0xff] }
  0x4d   : > { %685 = vst [vmem:[%s1283_s17 + $0x108] sm:$0xff] %v429_v5  ;;  %v461_v5 = vmul.f32 2.5, %v205_v0  ;;  %v237_v0 = vld [vmem:[%s1270_s24 + $0x308] sm:$0xff] }
  0x4e   : > { %686 = vst [vmem:[%s1283_s17 + $0x110] sm:$0xff] %v430_v7  ;;  %v462_v7 = vmul.f32 2.5, %v206_v2  ;;  %v238_v2 = vld [vmem:[%s1270_s24 + $0x310] sm:$0xff] }
  0x4f   : > { %687 = vst [vmem:[%s1283_s17 + $0x118] sm:$0xff] %v431_v9  ;;  %v463_v9 = vmul.f32 2.5, %v207_v4  ;;  %v239_v4 = vld [vmem:[%s1270_s24 + $0x318] sm:$0xff] }
  0x50   : > { %688 = vst [vmem:[%s1283_s17 + $0x120] sm:$0xff] %v432_v11  ;;  %v464_v11 = vmul.f32 2.5, %v208_v6  ;;  %v240_v6 = vld [vmem:[%s1270_s24 + $0x320] sm:$0xff] }
  0x51   : > { %689 = vst [vmem:[%s1283_s17 + $0x128] sm:$0xff] %v433_v13  ;;  %v465_v13 = vmul.f32 2.5, %v209_v8  ;;  %v241_v8 = vld [vmem:[%s1270_s24 + $0x328] sm:$0xff] }
  0x52   : > { %690 = vst [vmem:[%s1283_s17 + $0x130] sm:$0xff] %v434_v15  ;;  %v466_v15 = vmul.f32 2.5, %v210_v10  ;;  %v242_v10 = vld [vmem:[%s1270_s24 + $0x330] sm:$0xff] }
  0x53   : > { %691 = vst [vmem:[%s1283_s17 + $0x138] sm:$0xff] %v435_v17  ;;  %v467_v17 = vmul.f32 2.5, %v211_v12  ;;  %v243_v12 = vld [vmem:[%s1270_s24 + $0x338] sm:$0xff] }
  0x54   : > { %692 = vst [vmem:[%s1283_s17 + $0x140] sm:$0xff] %v436_v19  ;;  %v468_v19 = vmul.f32 2.5, %v212_v14  ;;  %v244_v14 = vld [vmem:[%s1270_s24 + $0x340] sm:$0xff] }
  0x55   : > { %693 = vst [vmem:[%s1283_s17 + $0x148] sm:$0xff] %v437_v21  ;;  %v469_v21 = vmul.f32 2.5, %v213_v16  ;;  %v245_v16 = vld [vmem:[%s1270_s24 + $0x348] sm:$0xff] }
  0x56   : > { %694 = vst [vmem:[%s1283_s17 + $0x150] sm:$0xff] %v438_v23  ;;  %v470_v23 = vmul.f32 2.5, %v214_v18  ;;  %v246_v18 = vld [vmem:[%s1270_s24 + $0x350] sm:$0xff] }
  0x57   : > { %695 = vst [vmem:[%s1283_s17 + $0x158] sm:$0xff] %v439_v25  ;;  %v471_v25 = vmul.f32 2.5, %v215_v20  ;;  %v247_v20 = vld [vmem:[%s1270_s24 + $0x358] sm:$0xff] }
  0x58   : > { %696 = vst [vmem:[%s1283_s17 + $0x160] sm:$0xff] %v440_v27  ;;  %v472_v27 = vmul.f32 2.5, %v216_v22  ;;  %v248_v22 = vld [vmem:[%s1270_s24 + $0x360] sm:$0xff] }
  0x59   : > { %697 = vst [vmem:[%s1283_s17 + $0x168] sm:$0xff] %v441_v29  ;;  %v473_v29 = vmul.f32 2.5, %v217_v24  ;;  %v249_v24 = vld [vmem:[%s1270_s24 + $0x368] sm:$0xff] }
  0x5a   : > { %698 = vst [vmem:[%s1283_s17 + $0x170] sm:$0xff] %v442_v31  ;;  %v474_v31 = vmul.f32 2.5, %v218_v26  ;;  %v250_v26 = vld [vmem:[%s1270_s24 + $0x370] sm:$0xff] }
  0x5b   : > { %699 = vst [vmem:[%s1283_s17 + $0x178] sm:$0xff] %v443_v33  ;;  %v475_v33 = vmul.f32 2.5, %v219_v28  ;;  %v251_v28 = vld [vmem:[%s1270_s24 + $0x378] sm:$0xff] }
  0x5c   : > { %700 = vst [vmem:[%s1283_s17 + $0x180] sm:$0xff] %v444_v35  ;;  %v476_v35 = vmul.f32 2.5, %v220_v30  ;;  %v252_v30 = vld [vmem:[%s1270_s24 + $0x380] sm:$0xff] }
  0x5d   : > { %701 = vst [vmem:[%s1283_s17 + $0x188] sm:$0xff] %v445_v37  ;;  %v477_v37 = vmul.f32 2.5, %v221_v32  ;;  %v253_v32 = vld [vmem:[%s1270_s24 + $0x388] sm:$0xff] }
  0x5e   : > { %702 = vst [vmem:[%s1283_s17 + $0x190] sm:$0xff] %v446_v39  ;;  %v478_v39 = vmul.f32 2.5, %v222_v34  ;;  %v254_v34 = vld [vmem:[%s1270_s24 + $0x390] sm:$0xff] }
  0x5f   : > { %703 = vst [vmem:[%s1283_s17 + $0x198] sm:$0xff] %v447_v41  ;;  %v479_v41 = vmul.f32 2.5, %v223_v36  ;;  %v255_v36 = vld [vmem:[%s1270_s24 + $0x398] sm:$0xff] }
  0x60   : > { %704 = vst [vmem:[%s1283_s17 + $0x1a0] sm:$0xff] %v448_v43  ;;  %v480_v43 = vmul.f32 2.5, %v224_v38  ;;  %v256_v38 = vld [vmem:[%s1270_s24 + $0x3a0] sm:$0xff] }
  0x61   : > { %705 = vst [vmem:[%s1283_s17 + $0x1a8] sm:$0xff] %v449_v45  ;;  %v481_v45 = vmul.f32 2.5, %v225_v40  ;;  %v257_v40 = vld [vmem:[%s1270_s24 + $0x3a8] sm:$0xff] }
  0x62   : > { %706 = vst [vmem:[%s1283_s17 + $0x1b0] sm:$0xff] %v450_v47  ;;  %v482_v47 = vmul.f32 2.5, %v226_v42  ;;  %v258_v42 = vld [vmem:[%s1270_s24 + $0x3b0] sm:$0xff] }
  0x63   : > { %707 = vst [vmem:[%s1283_s17 + $0x1b8] sm:$0xff] %v451_v49  ;;  %v483_v49 = vmul.f32 2.5, %v227_v44  ;;  %v259_v44 = vld [vmem:[%s1270_s24 + $0x3b8] sm:$0xff] }
  0x64   : > { %708 = vst [vmem:[%s1283_s17 + $0x1c0] sm:$0xff] %v452_v51  ;;  %v484_v51 = vmul.f32 2.5, %v228_v46  ;;  %v260_v46 = vld [vmem:[%s1270_s24 + $0x3c0] sm:$0xff] }
  0x65   : > { %709 = vst [vmem:[%s1283_s17 + $0x1c8] sm:$0xff] %v453_v53  ;;  %v485_v53 = vmul.f32 2.5, %v229_v48  ;;  %v261_v48 = vld [vmem:[%s1270_s24 + $0x3c8] sm:$0xff] }
  0x66   : > { %710 = vst [vmem:[%s1283_s17 + $0x1d0] sm:$0xff] %v454_v55  ;;  %v486_v55 = vmul.f32 2.5, %v230_v50  ;;  %v262_v50 = vld [vmem:[%s1270_s24 + $0x3d0] sm:$0xff] }
  0x67   : > { %711 = vst [vmem:[%s1283_s17 + $0x1d8] sm:$0xff] %v455_v57  ;;  %v487_v57 = vmul.f32 2.5, %v231_v52  ;;  %v263_v52 = vld [vmem:[%s1270_s24 + $0x3d8] sm:$0xff] }
  0x68   : > { %712 = vst [vmem:[%s1283_s17 + $0x1e0] sm:$0xff] %v456_v59  ;;  %v488_v59 = vmul.f32 2.5, %v232_v54  ;;  %v264_v54 = vld [vmem:[%s1270_s24 + $0x3e0] sm:$0xff] }
  0x69   : > { %713 = vst [vmem:[%s1283_s17 + $0x1e8] sm:$0xff] %v457_v61  ;;  %v489_v61 = vmul.f32 2.5, %v233_v56  ;;  %v265_v56 = vld [vmem:[%s1270_s24 + $0x3e8] sm:$0xff] }
  0x6a   : > { %714 = vst [vmem:[%s1283_s17 + $0x1f0] sm:$0xff] %v458_v63  ;;  %v490_v63 = vmul.f32 2.5, %v234_v58  ;;  %v266_v58 = vld [vmem:[%s1270_s24 + $0x3f0] sm:$0xff] }
  0x6b   : > { %715 = vst [vmem:[%s1283_s17 + $0x1f8] sm:$0xff] %v459_v1  ;;  %v491_v1 = vmul.f32 2.5, %v235_v60  ;;  %v267_v60 = vld [vmem:[%s1270_s24 + $0x3f8] sm:$0xff] }
  0x6c   : > { %716 = vst [vmem:[%s1283_s17 + $0x200] sm:$0xff] %v460_v3  ;;  %v492_v3 = vmul.f32 2.5, %v236_v62  ;;  %v268_v62 = vld [vmem:[%s1270_s24 + $0x400] sm:$0xff] }
  0x6d   : > { %717 = vst [vmem:[%s1283_s17 + $0x208] sm:$0xff] %v461_v5  ;;  %v493_v5 = vmul.f32 2.5, %v237_v0  ;;  %v269_v0 = vld [vmem:[%s1270_s24 + $0x408] sm:$0xff] }
  0x6e   : > { %718 = vst [vmem:[%s1283_s17 + $0x210] sm:$0xff] %v462_v7  ;;  %v494_v7 = vmul.f32 2.5, %v238_v2  ;;  %v270_v2 = vld [vmem:[%s1270_s24 + $0x410] sm:$0xff] }
  0x6f   : > { %719 = vst [vmem:[%s1283_s17 + $0x218] sm:$0xff] %v463_v9  ;;  %v495_v9 = vmul.f32 2.5, %v239_v4  ;;  %v271_v4 = vld [vmem:[%s1270_s24 + $0x418] sm:$0xff] }
  0x70   : > { %720 = vst [vmem:[%s1283_s17 + $0x220] sm:$0xff] %v464_v11  ;;  %v496_v11 = vmul.f32 2.5, %v240_v6  ;;  %v272_v6 = vld [vmem:[%s1270_s24 + $0x420] sm:$0xff] }
  0x71   : > { %721 = vst [vmem:[%s1283_s17 + $0x228] sm:$0xff] %v465_v13  ;;  %v497_v13 = vmul.f32 2.5, %v241_v8  ;;  %v273_v8 = vld [vmem:[%s1270_s24 + $0x428] sm:$0xff] }
  0x72   : > { %722 = vst [vmem:[%s1283_s17 + $0x230] sm:$0xff] %v466_v15  ;;  %v498_v15 = vmul.f32 2.5, %v242_v10  ;;  %v274_v10 = vld [vmem:[%s1270_s24 + $0x430] sm:$0xff] }
  0x73   : > { %723 = vst [vmem:[%s1283_s17 + $0x238] sm:$0xff] %v467_v17  ;;  %v499_v17 = vmul.f32 2.5, %v243_v12  ;;  %v275_v12 = vld [vmem:[%s1270_s24 + $0x438] sm:$0xff] }
  0x74   : > { %724 = vst [vmem:[%s1283_s17 + $0x240] sm:$0xff] %v468_v19  ;;  %v500_v19 = vmul.f32 2.5, %v244_v14  ;;  %v276_v14 = vld [vmem:[%s1270_s24 + $0x440] sm:$0xff] }
  0x75   : > { %725 = vst [vmem:[%s1283_s17 + $0x248] sm:$0xff] %v469_v21  ;;  %v501_v21 = vmul.f32 2.5, %v245_v16  ;;  %v277_v16 = vld [vmem:[%s1270_s24 + $0x448] sm:$0xff] }
  0x76   : > { %726 = vst [vmem:[%s1283_s17 + $0x250] sm:$0xff] %v470_v23  ;;  %v502_v23 = vmul.f32 2.5, %v246_v18  ;;  %v278_v18 = vld [vmem:[%s1270_s24 + $0x450] sm:$0xff] }
  0x77   : > { %727 = vst [vmem:[%s1283_s17 + $0x258] sm:$0xff] %v471_v25  ;;  %v503_v25 = vmul.f32 2.5, %v247_v20  ;;  %v279_v20 = vld [vmem:[%s1270_s24 + $0x458] sm:$0xff] }
  0x78   : > { %728 = vst [vmem:[%s1283_s17 + $0x260] sm:$0xff] %v472_v27  ;;  %v504_v27 = vmul.f32 2.5, %v248_v22  ;;  %v280_v22 = vld [vmem:[%s1270_s24 + $0x460] sm:$0xff] }
  0x79   : > { %729 = vst [vmem:[%s1283_s17 + $0x268] sm:$0xff] %v473_v29  ;;  %v505_v29 = vmul.f32 2.5, %v249_v24  ;;  %v281_v24 = vld [vmem:[%s1270_s24 + $0x468] sm:$0xff] }
  0x7a   : > { %730 = vst [vmem:[%s1283_s17 + $0x270] sm:$0xff] %v474_v31  ;;  %v506_v31 = vmul.f32 2.5, %v250_v26  ;;  %v282_v26 = vld [vmem:[%s1270_s24 + $0x470] sm:$0xff] }
  0x7b   : > { %731 = vst [vmem:[%s1283_s17 + $0x278] sm:$0xff] %v475_v33  ;;  %v507_v33 = vmul.f32 2.5, %v251_v28  ;;  %v283_v28 = vld [vmem:[%s1270_s24 + $0x478] sm:$0xff] }
  0x7c   : > { %732 = vst [vmem:[%s1283_s17 + $0x280] sm:$0xff] %v476_v35  ;;  %v508_v35 = vmul.f32 2.5, %v252_v30  ;;  %v284_v30 = vld [vmem:[%s1270_s24 + $0x480] sm:$0xff] }
  0x7d   : > { %733 = vst [vmem:[%s1283_s17 + $0x288] sm:$0xff] %v477_v37  ;;  %v509_v37 = vmul.f32 2.5, %v253_v32  ;;  %v285_v32 = vld [vmem:[%s1270_s24 + $0x488] sm:$0xff] }
  0x7e   : > { %734 = vst [vmem:[%s1283_s17 + $0x290] sm:$0xff] %v478_v39  ;;  %v510_v39 = vmul.f32 2.5, %v254_v34  ;;  %v286_v34 = vld [vmem:[%s1270_s24 + $0x490] sm:$0xff] }
  0x7f   : > { %735 = vst [vmem:[%s1283_s17 + $0x298] sm:$0xff] %v479_v41  ;;  %v511_v41 = vmul.f32 2.5, %v255_v36  ;;  %v287_v36 = vld [vmem:[%s1270_s24 + $0x498] sm:$0xff] }
  0x80   : > { %736 = vst [vmem:[%s1283_s17 + $0x2a0] sm:$0xff] %v480_v43  ;;  %v512_v43 = vmul.f32 2.5, %v256_v38  ;;  %v288_v38 = vld [vmem:[%s1270_s24 + $0x4a0] sm:$0xff] }
  0x81   : > { %737 = vst [vmem:[%s1283_s17 + $0x2a8] sm:$0xff] %v481_v45  ;;  %v513_v45 = vmul.f32 2.5, %v257_v40  ;;  %v289_v40 = vld [vmem:[%s1270_s24 + $0x4a8] sm:$0xff] }
  0x82   : > { %738 = vst [vmem:[%s1283_s17 + $0x2b0] sm:$0xff] %v482_v47  ;;  %v514_v47 = vmul.f32 2.5, %v258_v42  ;;  %v290_v42 = vld [vmem:[%s1270_s24 + $0x4b0] sm:$0xff] }
  0x83   : > { %739 = vst [vmem:[%s1283_s17 + $0x2b8] sm:$0xff] %v483_v49  ;;  %v515_v49 = vmul.f32 2.5, %v259_v44  ;;  %v291_v44 = vld [vmem:[%s1270_s24 + $0x4b8] sm:$0xff] }
  0x84   : > { %740 = vst [vmem:[%s1283_s17 + $0x2c0] sm:$0xff] %v484_v51  ;;  %v516_v51 = vmul.f32 2.5, %v260_v46  ;;  %v292_v46 = vld [vmem:[%s1270_s24 + $0x4c0] sm:$0xff] }
  0x85   : > { %741 = vst [vmem:[%s1283_s17 + $0x2c8] sm:$0xff] %v485_v53  ;;  %v517_v53 = vmul.f32 2.5, %v261_v48  ;;  %v293_v48 = vld [vmem:[%s1270_s24 + $0x4c8] sm:$0xff] }
  0x86   : > { %742 = vst [vmem:[%s1283_s17 + $0x2d0] sm:$0xff] %v486_v55  ;;  %v518_v55 = vmul.f32 2.5, %v262_v50  ;;  %v294_v50 = vld [vmem:[%s1270_s24 + $0x4d0] sm:$0xff] }
  0x87   : > { %743 = vst [vmem:[%s1283_s17 + $0x2d8] sm:$0xff] %v487_v57  ;;  %v519_v57 = vmul.f32 2.5, %v263_v52  ;;  %v295_v52 = vld [vmem:[%s1270_s24 + $0x4d8] sm:$0xff] }
  0x88   : > { %744 = vst [vmem:[%s1283_s17 + $0x2e0] sm:$0xff] %v488_v59  ;;  %v520_v59 = vmul.f32 2.5, %v264_v54  ;;  %v296_v54 = vld [vmem:[%s1270_s24 + $0x4e0] sm:$0xff] }
  0x89   : > { %745 = vst [vmem:[%s1283_s17 + $0x2e8] sm:$0xff] %v489_v61  ;;  %v521_v61 = vmul.f32 2.5, %v265_v56  ;;  %v297_v56 = vld [vmem:[%s1270_s24 + $0x4e8] sm:$0xff] }
  0x8a   : > { %746 = vst [vmem:[%s1283_s17 + $0x2f0] sm:$0xff] %v490_v63  ;;  %v522_v63 = vmul.f32 2.5, %v266_v58  ;;  %v298_v58 = vld [vmem:[%s1270_s24 + $0x4f0] sm:$0xff] }
  0x8b   : > { %747 = vst [vmem:[%s1283_s17 + $0x2f8] sm:$0xff] %v491_v1  ;;  %v523_v1 = vmul.f32 2.5, %v267_v60  ;;  %v299_v60 = vld [vmem:[%s1270_s24 + $0x4f8] sm:$0xff] }
  0x8c   : > { %748 = vst [vmem:[%s1283_s17 + $0x300] sm:$0xff] %v492_v3  ;;  %v524_v3 = vmul.f32 2.5, %v268_v62  ;;  %v300_v62 = vld [vmem:[%s1270_s24 + $0x500] sm:$0xff] }
  0x8d   : > { %749 = vst [vmem:[%s1283_s17 + $0x308] sm:$0xff] %v493_v5  ;;  %v525_v5 = vmul.f32 2.5, %v269_v0  ;;  %v301_v0 = vld [vmem:[%s1270_s24 + $0x508] sm:$0xff] }
  0x8e   : > { %750 = vst [vmem:[%s1283_s17 + $0x310] sm:$0xff] %v494_v7  ;;  %v526_v7 = vmul.f32 2.5, %v270_v2  ;;  %v302_v2 = vld [vmem:[%s1270_s24 + $0x510] sm:$0xff] }
  0x8f   : > { %751 = vst [vmem:[%s1283_s17 + $0x318] sm:$0xff] %v495_v9  ;;  %v527_v9 = vmul.f32 2.5, %v271_v4  ;;  %v303_v4 = vld [vmem:[%s1270_s24 + $0x518] sm:$0xff] }
  0x90   : > { %752 = vst [vmem:[%s1283_s17 + $0x320] sm:$0xff] %v496_v11  ;;  %v528_v11 = vmul.f32 2.5, %v272_v6  ;;  %v304_v6 = vld [vmem:[%s1270_s24 + $0x520] sm:$0xff] }
  0x91   : > { %753 = vst [vmem:[%s1283_s17 + $0x328] sm:$0xff] %v497_v13  ;;  %v529_v13 = vmul.f32 2.5, %v273_v8  ;;  %v305_v8 = vld [vmem:[%s1270_s24 + $0x528] sm:$0xff] }
  0x92   : > { %754 = vst [vmem:[%s1283_s17 + $0x330] sm:$0xff] %v498_v15  ;;  %v530_v15 = vmul.f32 2.5, %v274_v10  ;;  %v306_v10 = vld [vmem:[%s1270_s24 + $0x530] sm:$0xff] }
  0x93   : > { %755 = vst [vmem:[%s1283_s17 + $0x338] sm:$0xff] %v499_v17  ;;  %v531_v17 = vmul.f32 2.5, %v275_v12  ;;  %v307_v12 = vld [vmem:[%s1270_s24 + $0x538] sm:$0xff] }
  0x94   : > { %756 = vst [vmem:[%s1283_s17 + $0x340] sm:$0xff] %v500_v19  ;;  %v532_v19 = vmul.f32 2.5, %v276_v14  ;;  %v308_v14 = vld [vmem:[%s1270_s24 + $0x540] sm:$0xff] }
  0x95   : > { %757 = vst [vmem:[%s1283_s17 + $0x348] sm:$0xff] %v501_v21  ;;  %v533_v21 = vmul.f32 2.5, %v277_v16  ;;  %v309_v16 = vld [vmem:[%s1270_s24 + $0x548] sm:$0xff] }
  0x96   : > { %758 = vst [vmem:[%s1283_s17 + $0x350] sm:$0xff] %v502_v23  ;;  %v534_v23 = vmul.f32 2.5, %v278_v18  ;;  %v310_v18 = vld [vmem:[%s1270_s24 + $0x550] sm:$0xff] }
  0x97   : > { %759 = vst [vmem:[%s1283_s17 + $0x358] sm:$0xff] %v503_v25  ;;  %v535_v25 = vmul.f32 2.5, %v279_v20  ;;  %v311_v20 = vld [vmem:[%s1270_s24 + $0x558] sm:$0xff] }
  0x98   : > { %760 = vst [vmem:[%s1283_s17 + $0x360] sm:$0xff] %v504_v27  ;;  %v536_v27 = vmul.f32 2.5, %v280_v22  ;;  %v312_v22 = vld [vmem:[%s1270_s24 + $0x560] sm:$0xff] }
  0x99   : > { %761 = vst [vmem:[%s1283_s17 + $0x368] sm:$0xff] %v505_v29  ;;  %v537_v29 = vmul.f32 2.5, %v281_v24  ;;  %v313_v24 = vld [vmem:[%s1270_s24 + $0x568] sm:$0xff] }
  0x9a   : > { %762 = vst [vmem:[%s1283_s17 + $0x370] sm:$0xff] %v506_v31  ;;  %v538_v31 = vmul.f32 2.5, %v282_v26  ;;  %v314_v26 = vld [vmem:[%s1270_s24 + $0x570] sm:$0xff] }
  0x9b   : > { %763 = vst [vmem:[%s1283_s17 + $0x378] sm:$0xff] %v507_v33  ;;  %v539_v33 = vmul.f32 2.5, %v283_v28  ;;  %v315_v28 = vld [vmem:[%s1270_s24 + $0x578] sm:$0xff] }
  0x9c   : > { %764 = vst [vmem:[%s1283_s17 + $0x380] sm:$0xff] %v508_v35  ;;  %v540_v35 = vmul.f32 2.5, %v284_v30  ;;  %v316_v30 = vld [vmem:[%s1270_s24 + $0x580] sm:$0xff] }
  0x9d   : > { %765 = vst [vmem:[%s1283_s17 + $0x388] sm:$0xff] %v509_v37  ;;  %v541_v37 = vmul.f32 2.5, %v285_v32  ;;  %v317_v32 = vld [vmem:[%s1270_s24 + $0x588] sm:$0xff] }
  0x9e   : > { %766 = vst [vmem:[%s1283_s17 + $0x390] sm:$0xff] %v510_v39  ;;  %v542_v39 = vmul.f32 2.5, %v286_v34  ;;  %v318_v34 = vld [vmem:[%s1270_s24 + $0x590] sm:$0xff] }
  0x9f   : > { %767 = vst [vmem:[%s1283_s17 + $0x398] sm:$0xff] %v511_v41  ;;  %v543_v41 = vmul.f32 2.5, %v287_v36  ;;  %v319_v36 = vld [vmem:[%s1270_s24 + $0x598] sm:$0xff] }
  0xa0   : > { %768 = vst [vmem:[%s1283_s17 + $0x3a0] sm:$0xff] %v512_v43  ;;  %v544_v43 = vmul.f32 2.5, %v288_v38  ;;  %v320_v38 = vld [vmem:[%s1270_s24 + $0x5a0] sm:$0xff] }
  0xa1   : > { %769 = vst [vmem:[%s1283_s17 + $0x3a8] sm:$0xff] %v513_v45  ;;  %v545_v45 = vmul.f32 2.5, %v289_v40  ;;  %v321_v40 = vld [vmem:[%s1270_s24 + $0x5a8] sm:$0xff] }
  0xa2   : > { %770 = vst [vmem:[%s1283_s17 + $0x3b0] sm:$0xff] %v514_v47  ;;  %v546_v47 = vmul.f32 2.5, %v290_v42  ;;  %v322_v42 = vld [vmem:[%s1270_s24 + $0x5b0] sm:$0xff] }
  0xa3   : > { %771 = vst [vmem:[%s1283_s17 + $0x3b8] sm:$0xff] %v515_v49  ;;  %v547_v49 = vmul.f32 2.5, %v291_v44  ;;  %v323_v44 = vld [vmem:[%s1270_s24 + $0x5b8] sm:$0xff] }
  0xa4   : > { %772 = vst [vmem:[%s1283_s17 + $0x3c0] sm:$0xff] %v516_v51  ;;  %v548_v51 = vmul.f32 2.5, %v292_v46  ;;  %v324_v46 = vld [vmem:[%s1270_s24 + $0x5c0] sm:$0xff] }
  0xa5   : > { %773 = vst [vmem:[%s1283_s17 + $0x3c8] sm:$0xff] %v517_v53  ;;  %v549_v53 = vmul.f32 2.5, %v293_v48  ;;  %v325_v48 = vld [vmem:[%s1270_s24 + $0x5c8] sm:$0xff] }
  0xa6   : > { %774 = vst [vmem:[%s1283_s17 + $0x3d0] sm:$0xff] %v518_v55  ;;  %v550_v55 = vmul.f32 2.5, %v294_v50  ;;  %v326_v50 = vld [vmem:[%s1270_s24 + $0x5d0] sm:$0xff] }
  0xa7   : > { %775 = vst [vmem:[%s1283_s17 + $0x3d8] sm:$0xff] %v519_v57  ;;  %v551_v57 = vmul.f32 2.5, %v295_v52  ;;  %v327_v52 = vld [vmem:[%s1270_s24 + $0x5d8] sm:$0xff] }
  0xa8   : > { %776 = vst [vmem:[%s1283_s17 + $0x3e0] sm:$0xff] %v520_v59  ;;  %v552_v59 = vmul.f32 2.5, %v296_v54  ;;  %v328_v54 = vld [vmem:[%s1270_s24 + $0x5e0] sm:$0xff] }
  0xa9   : > { %777 = vst [vmem:[%s1283_s17 + $0x3e8] sm:$0xff] %v521_v61  ;;  %v553_v61 = vmul.f32 2.5, %v297_v56  ;;  %v329_v56 = vld [vmem:[%s1270_s24 + $0x5e8] sm:$0xff] }
  0xaa   : > { %778 = vst [vmem:[%s1283_s17 + $0x3f0] sm:$0xff] %v522_v63  ;;  %v554_v63 = vmul.f32 2.5, %v298_v58  ;;  %v330_v58 = vld [vmem:[%s1270_s24 + $0x5f0] sm:$0xff] }
  0xab   : > { %779 = vst [vmem:[%s1283_s17 + $0x3f8] sm:$0xff] %v523_v1  ;;  %v555_v1 = vmul.f32 2.5, %v299_v60  ;;  %v331_v60 = vld [vmem:[%s1270_s24 + $0x5f8] sm:$0xff] }
  0xac   : > { %780 = vst [vmem:[%s1283_s17 + $0x400] sm:$0xff] %v524_v3  ;;  %v556_v3 = vmul.f32 2.5, %v300_v62  ;;  %v332_v62 = vld [vmem:[%s1270_s24 + $0x600] sm:$0xff] }
  0xad   : > { %781 = vst [vmem:[%s1283_s17 + $0x408] sm:$0xff] %v525_v5  ;;  %v557_v5 = vmul.f32 2.5, %v301_v0  ;;  %v333_v0 = vld [vmem:[%s1270_s24 + $0x608] sm:$0xff] }
  0xae   : > { %782 = vst [vmem:[%s1283_s17 + $0x410] sm:$0xff] %v526_v7  ;;  %v558_v7 = vmul.f32 2.5, %v302_v2  ;;  %v334_v2 = vld [vmem:[%s1270_s24 + $0x610] sm:$0xff] }
  0xaf   : > { %783 = vst [vmem:[%s1283_s17 + $0x418] sm:$0xff] %v527_v9  ;;  %v559_v9 = vmul.f32 2.5, %v303_v4  ;;  %v335_v4 = vld [vmem:[%s1270_s24 + $0x618] sm:$0xff] }
  0xb0   : > { %784 = vst [vmem:[%s1283_s17 + $0x420] sm:$0xff] %v528_v11  ;;  %v560_v11 = vmul.f32 2.5, %v304_v6  ;;  %v336_v6 = vld [vmem:[%s1270_s24 + $0x620] sm:$0xff] }
  0xb1   : > { %785 = vst [vmem:[%s1283_s17 + $0x428] sm:$0xff] %v529_v13  ;;  %v561_v13 = vmul.f32 2.5, %v305_v8  ;;  %v337_v8 = vld [vmem:[%s1270_s24 + $0x628] sm:$0xff] }
  0xb2   : > { %786 = vst [vmem:[%s1283_s17 + $0x430] sm:$0xff] %v530_v15  ;;  %v562_v15 = vmul.f32 2.5, %v306_v10  ;;  %v338_v10 = vld [vmem:[%s1270_s24 + $0x630] sm:$0xff] }
  0xb3   : > { %787 = vst [vmem:[%s1283_s17 + $0x438] sm:$0xff] %v531_v17  ;;  %v563_v17 = vmul.f32 2.5, %v307_v12  ;;  %v339_v12 = vld [vmem:[%s1270_s24 + $0x638] sm:$0xff] }
  0xb4   : > { %788 = vst [vmem:[%s1283_s17 + $0x440] sm:$0xff] %v532_v19  ;;  %v564_v19 = vmul.f32 2.5, %v308_v14  ;;  %v340_v14 = vld [vmem:[%s1270_s24 + $0x640] sm:$0xff] }
  0xb5   : > { %789 = vst [vmem:[%s1283_s17 + $0x448] sm:$0xff] %v533_v21  ;;  %v565_v21 = vmul.f32 2.5, %v309_v16  ;;  %v341_v16 = vld [vmem:[%s1270_s24 + $0x648] sm:$0xff] }
  0xb6   : > { %790 = vst [vmem:[%s1283_s17 + $0x450] sm:$0xff] %v534_v23  ;;  %v566_v23 = vmul.f32 2.5, %v310_v18  ;;  %v342_v18 = vld [vmem:[%s1270_s24 + $0x650] sm:$0xff] }
  0xb7   : > { %791 = vst [vmem:[%s1283_s17 + $0x458] sm:$0xff] %v535_v25  ;;  %v567_v25 = vmul.f32 2.5, %v311_v20  ;;  %v343_v20 = vld [vmem:[%s1270_s24 + $0x658] sm:$0xff] }
  0xb8   : > { %792 = vst [vmem:[%s1283_s17 + $0x460] sm:$0xff] %v536_v27  ;;  %v568_v27 = vmul.f32 2.5, %v312_v22  ;;  %v344_v22 = vld [vmem:[%s1270_s24 + $0x660] sm:$0xff] }
  0xb9   : > { %793 = vst [vmem:[%s1283_s17 + $0x468] sm:$0xff] %v537_v29  ;;  %v569_v29 = vmul.f32 2.5, %v313_v24  ;;  %v345_v24 = vld [vmem:[%s1270_s24 + $0x668] sm:$0xff] }
  0xba   : > { %794 = vst [vmem:[%s1283_s17 + $0x470] sm:$0xff] %v538_v31  ;;  %v570_v31 = vmul.f32 2.5, %v314_v26  ;;  %v346_v26 = vld [vmem:[%s1270_s24 + $0x670] sm:$0xff] }
  0xbb   : > { %795 = vst [vmem:[%s1283_s17 + $0x478] sm:$0xff] %v539_v33  ;;  %v571_v33 = vmul.f32 2.5, %v315_v28  ;;  %v347_v28 = vld [vmem:[%s1270_s24 + $0x678] sm:$0xff] }
  0xbc   : > { %796 = vst [vmem:[%s1283_s17 + $0x480] sm:$0xff] %v540_v35  ;;  %v572_v35 = vmul.f32 2.5, %v316_v30  ;;  %v348_v30 = vld [vmem:[%s1270_s24 + $0x680] sm:$0xff] }
  0xbd   : > { %797 = vst [vmem:[%s1283_s17 + $0x488] sm:$0xff] %v541_v37  ;;  %v573_v37 = vmul.f32 2.5, %v317_v32  ;;  %v349_v32 = vld [vmem:[%s1270_s24 + $0x688] sm:$0xff] }
  0xbe   : > { %798 = vst [vmem:[%s1283_s17 + $0x490] sm:$0xff] %v542_v39  ;;  %v574_v39 = vmul.f32 2.5, %v318_v34  ;;  %v350_v34 = vld [vmem:[%s1270_s24 + $0x690] sm:$0xff] }
  0xbf   : > { %799 = vst [vmem:[%s1283_s17 + $0x498] sm:$0xff] %v543_v41  ;;  %v575_v41 = vmul.f32 2.5, %v319_v36  ;;  %v351_v36 = vld [vmem:[%s1270_s24 + $0x698] sm:$0xff] }
  0xc0   : > { %800 = vst [vmem:[%s1283_s17 + $0x4a0] sm:$0xff] %v544_v43  ;;  %v576_v43 = vmul.f32 2.5, %v320_v38  ;;  %v352_v38 = vld [vmem:[%s1270_s24 + $0x6a0] sm:$0xff] }
  0xc1   : > { %801 = vst [vmem:[%s1283_s17 + $0x4a8] sm:$0xff] %v545_v45  ;;  %v577_v45 = vmul.f32 2.5, %v321_v40  ;;  %v353_v40 = vld [vmem:[%s1270_s24 + $0x6a8] sm:$0xff] }
  0xc2   : > { %802 = vst [vmem:[%s1283_s17 + $0x4b0] sm:$0xff] %v546_v47  ;;  %v578_v47 = vmul.f32 2.5, %v322_v42  ;;  %v354_v42 = vld [vmem:[%s1270_s24 + $0x6b0] sm:$0xff] }
  0xc3   : > { %803 = vst [vmem:[%s1283_s17 + $0x4b8] sm:$0xff] %v547_v49  ;;  %v579_v49 = vmul.f32 2.5, %v323_v44  ;;  %v355_v44 = vld [vmem:[%s1270_s24 + $0x6b8] sm:$0xff] }
  0xc4   : > { %804 = vst [vmem:[%s1283_s17 + $0x4c0] sm:$0xff] %v548_v51  ;;  %v580_v51 = vmul.f32 2.5, %v324_v46  ;;  %v356_v46 = vld [vmem:[%s1270_s24 + $0x6c0] sm:$0xff] }
  0xc5   : > { %805 = vst [vmem:[%s1283_s17 + $0x4c8] sm:$0xff] %v549_v53  ;;  %v581_v53 = vmul.f32 2.5, %v325_v48  ;;  %v357_v48 = vld [vmem:[%s1270_s24 + $0x6c8] sm:$0xff] }
  0xc6   : > { %806 = vst [vmem:[%s1283_s17 + $0x4d0] sm:$0xff] %v550_v55  ;;  %v582_v55 = vmul.f32 2.5, %v326_v50  ;;  %v358_v50 = vld [vmem:[%s1270_s24 + $0x6d0] sm:$0xff] }
  0xc7   : > { %807 = vst [vmem:[%s1283_s17 + $0x4d8] sm:$0xff] %v551_v57  ;;  %v583_v57 = vmul.f32 2.5, %v327_v52  ;;  %v359_v52 = vld [vmem:[%s1270_s24 + $0x6d8] sm:$0xff] }
  0xc8   : > { %808 = vst [vmem:[%s1283_s17 + $0x4e0] sm:$0xff] %v552_v59  ;;  %v584_v59 = vmul.f32 2.5, %v328_v54  ;;  %v360_v54 = vld [vmem:[%s1270_s24 + $0x6e0] sm:$0xff] }
  0xc9   : > { %809 = vst [vmem:[%s1283_s17 + $0x4e8] sm:$0xff] %v553_v61  ;;  %v585_v61 = vmul.f32 2.5, %v329_v56  ;;  %v361_v56 = vld [vmem:[%s1270_s24 + $0x6e8] sm:$0xff] }
  0xca   : > { %810 = vst [vmem:[%s1283_s17 + $0x4f0] sm:$0xff] %v554_v63  ;;  %v586_v63 = vmul.f32 2.5, %v330_v58  ;;  %v362_v58 = vld [vmem:[%s1270_s24 + $0x6f0] sm:$0xff] }
  0xcb   : > { %811 = vst [vmem:[%s1283_s17 + $0x4f8] sm:$0xff] %v555_v1  ;;  %v587_v1 = vmul.f32 2.5, %v331_v60  ;;  %v363_v60 = vld [vmem:[%s1270_s24 + $0x6f8] sm:$0xff] }
  0xcc   : > { %812 = vst [vmem:[%s1283_s17 + $0x500] sm:$0xff] %v556_v3  ;;  %v588_v3 = vmul.f32 2.5, %v332_v62  ;;  %v364_v62 = vld [vmem:[%s1270_s24 + $0x700] sm:$0xff] }
  0xcd   : > { %813 = vst [vmem:[%s1283_s17 + $0x508] sm:$0xff] %v557_v5  ;;  %v589_v5 = vmul.f32 2.5, %v333_v0  ;;  %v365_v0 = vld [vmem:[%s1270_s24 + $0x708] sm:$0xff] }
  0xce   : > { %814 = vst [vmem:[%s1283_s17 + $0x510] sm:$0xff] %v558_v7  ;;  %v590_v7 = vmul.f32 2.5, %v334_v2  ;;  %v366_v2 = vld [vmem:[%s1270_s24 + $0x710] sm:$0xff] }
  0xcf   : > { %815 = vst [vmem:[%s1283_s17 + $0x518] sm:$0xff] %v559_v9  ;;  %v591_v9 = vmul.f32 2.5, %v335_v4  ;;  %v367_v4 = vld [vmem:[%s1270_s24 + $0x718] sm:$0xff] }
  0xd0   : > { %816 = vst [vmem:[%s1283_s17 + $0x520] sm:$0xff] %v560_v11  ;;  %v592_v11 = vmul.f32 2.5, %v336_v6  ;;  %v368_v6 = vld [vmem:[%s1270_s24 + $0x720] sm:$0xff] }
  0xd1   : > { %817 = vst [vmem:[%s1283_s17 + $0x528] sm:$0xff] %v561_v13  ;;  %v593_v13 = vmul.f32 2.5, %v337_v8  ;;  %v369_v8 = vld [vmem:[%s1270_s24 + $0x728] sm:$0xff] }
  0xd2   : > { %818 = vst [vmem:[%s1283_s17 + $0x530] sm:$0xff] %v562_v15  ;;  %v594_v15 = vmul.f32 2.5, %v338_v10  ;;  %v370_v10 = vld [vmem:[%s1270_s24 + $0x730] sm:$0xff] }
  0xd3   : > { %819 = vst [vmem:[%s1283_s17 + $0x538] sm:$0xff] %v563_v17  ;;  %v595_v17 = vmul.f32 2.5, %v339_v12  ;;  %v371_v12 = vld [vmem:[%s1270_s24 + $0x738] sm:$0xff] }
  0xd4   : > { %820 = vst [vmem:[%s1283_s17 + $0x540] sm:$0xff] %v564_v19  ;;  %v596_v19 = vmul.f32 2.5, %v340_v14  ;;  %v372_v14 = vld [vmem:[%s1270_s24 + $0x740] sm:$0xff] }
  0xd5   : > { %821 = vst [vmem:[%s1283_s17 + $0x548] sm:$0xff] %v565_v21  ;;  %v597_v21 = vmul.f32 2.5, %v341_v16  ;;  %v373_v16 = vld [vmem:[%s1270_s24 + $0x748] sm:$0xff] }
  0xd6   : > { %822 = vst [vmem:[%s1283_s17 + $0x550] sm:$0xff] %v566_v23  ;;  %v598_v23 = vmul.f32 2.5, %v342_v18  ;;  %v374_v18 = vld [vmem:[%s1270_s24 + $0x750] sm:$0xff] }
  0xd7   : > { %823 = vst [vmem:[%s1283_s17 + $0x558] sm:$0xff] %v567_v25  ;;  %v599_v25 = vmul.f32 2.5, %v343_v20  ;;  %v375_v20 = vld [vmem:[%s1270_s24 + $0x758] sm:$0xff] }
  0xd8   : > { %824 = vst [vmem:[%s1283_s17 + $0x560] sm:$0xff] %v568_v27  ;;  %v600_v27 = vmul.f32 2.5, %v344_v22  ;;  %v376_v22 = vld [vmem:[%s1270_s24 + $0x760] sm:$0xff] }
  0xd9   : > { %825 = vst [vmem:[%s1283_s17 + $0x568] sm:$0xff] %v569_v29  ;;  %v601_v29 = vmul.f32 2.5, %v345_v24  ;;  %v377_v24 = vld [vmem:[%s1270_s24 + $0x768] sm:$0xff] }
  0xda   : > { %826 = vst [vmem:[%s1283_s17 + $0x570] sm:$0xff] %v570_v31  ;;  %v602_v31 = vmul.f32 2.5, %v346_v26  ;;  %v378_v26 = vld [vmem:[%s1270_s24 + $0x770] sm:$0xff] }
  0xdb   : > { %827 = vst [vmem:[%s1283_s17 + $0x578] sm:$0xff] %v571_v33  ;;  %v603_v33 = vmul.f32 2.5, %v347_v28  ;;  %v379_v28 = vld [vmem:[%s1270_s24 + $0x778] sm:$0xff] }
  0xdc   : > { %828 = vst [vmem:[%s1283_s17 + $0x580] sm:$0xff] %v572_v35  ;;  %v604_v35 = vmul.f32 2.5, %v348_v30  ;;  %v380_v30 = vld [vmem:[%s1270_s24 + $0x780] sm:$0xff] }
  0xdd   : > { %829 = vst [vmem:[%s1283_s17 + $0x588] sm:$0xff] %v573_v37  ;;  %v605_v37 = vmul.f32 2.5, %v349_v32  ;;  %v381_v32 = vld [vmem:[%s1270_s24 + $0x788] sm:$0xff] }
  0xde   : > { %830 = vst [vmem:[%s1283_s17 + $0x590] sm:$0xff] %v574_v39  ;;  %v606_v39 = vmul.f32 2.5, %v350_v34  ;;  %v382_v34 = vld [vmem:[%s1270_s24 + $0x790] sm:$0xff] }
  0xdf   : > { %831 = vst [vmem:[%s1283_s17 + $0x598] sm:$0xff] %v575_v41  ;;  %v607_v41 = vmul.f32 2.5, %v351_v36  ;;  %v383_v36 = vld [vmem:[%s1270_s24 + $0x798] sm:$0xff] }
  0xe0   : > { %832 = vst [vmem:[%s1283_s17 + $0x5a0] sm:$0xff] %v576_v43  ;;  %v608_v43 = vmul.f32 2.5, %v352_v38  ;;  %v384_v38 = vld [vmem:[%s1270_s24 + $0x7a0] sm:$0xff] }
  0xe1   : > { %833 = vst [vmem:[%s1283_s17 + $0x5a8] sm:$0xff] %v577_v45  ;;  %v609_v45 = vmul.f32 2.5, %v353_v40  ;;  %v385_v40 = vld [vmem:[%s1270_s24 + $0x7a8] sm:$0xff] }
  0xe2   : > { %834 = vst [vmem:[%s1283_s17 + $0x5b0] sm:$0xff] %v578_v47  ;;  %v610_v47 = vmul.f32 2.5, %v354_v42  ;;  %v386_v42 = vld [vmem:[%s1270_s24 + $0x7b0] sm:$0xff] }
  0xe3   : > { %835 = vst [vmem:[%s1283_s17 + $0x5b8] sm:$0xff] %v579_v49  ;;  %v611_v49 = vmul.f32 2.5, %v355_v44  ;;  %v387_v44 = vld [vmem:[%s1270_s24 + $0x7b8] sm:$0xff] }
  0xe4   : > { %836 = vst [vmem:[%s1283_s17 + $0x5c0] sm:$0xff] %v580_v51  ;;  %v612_v51 = vmul.f32 2.5, %v356_v46  ;;  %v388_v46 = vld [vmem:[%s1270_s24 + $0x7c0] sm:$0xff] }
  0xe5   : > { %837 = vst [vmem:[%s1283_s17 + $0x5c8] sm:$0xff] %v581_v53  ;;  %v613_v53 = vmul.f32 2.5, %v357_v48  ;;  %v389_v48 = vld [vmem:[%s1270_s24 + $0x7c8] sm:$0xff] }
  0xe6   : > { %838 = vst [vmem:[%s1283_s17 + $0x5d0] sm:$0xff] %v582_v55  ;;  %v614_v55 = vmul.f32 2.5, %v358_v50  ;;  %v390_v50 = vld [vmem:[%s1270_s24 + $0x7d0] sm:$0xff] }
  0xe7   : > { %839 = vst [vmem:[%s1283_s17 + $0x5d8] sm:$0xff] %v583_v57  ;;  %v615_v57 = vmul.f32 2.5, %v359_v52  ;;  %v391_v52 = vld [vmem:[%s1270_s24 + $0x7d8] sm:$0xff] }
  0xe8   : > { %840 = vst [vmem:[%s1283_s17 + $0x5e0] sm:$0xff] %v584_v59  ;;  %v616_v59 = vmul.f32 2.5, %v360_v54  ;;  %v392_v54 = vld [vmem:[%s1270_s24 + $0x7e0] sm:$0xff] }
  0xe9   : > { %841 = vst [vmem:[%s1283_s17 + $0x5e8] sm:$0xff] %v585_v61  ;;  %v617_v61 = vmul.f32 2.5, %v361_v56  ;;  %v393_v56 = vld [vmem:[%s1270_s24 + $0x7e8] sm:$0xff] }
  0xea   : > { %842 = vst [vmem:[%s1283_s17 + $0x5f0] sm:$0xff] %v586_v63  ;;  %v618_v63 = vmul.f32 2.5, %v362_v58  ;;  %v394_v58 = vld [vmem:[%s1270_s24 + $0x7f0] sm:$0xff] }
  0xeb   : > { %843 = vst [vmem:[%s1283_s17 + $0x5f8] sm:$0xff] %v587_v1  ;;  %v619_v1 = vmul.f32 2.5, %v363_v60  ;;  %v395_v60 = vld [vmem:[%s1270_s24 + $0x7f8] sm:$0xff] }
  0xec   : > { %844 = vst [vmem:[%s1283_s17 + $0x600] sm:$0xff] %v588_v3  ;;  %v620_v3 = vmul.f32 2.5, %v364_v62  ;;  %v650_v62 = vmul.f32 2.5, %v394_v58 }
  0xed   : > { %845 = vst [vmem:[%s1283_s17 + $0x608] sm:$0xff] %v589_v5  ;;  %v621_v5 = vmul.f32 2.5, %v365_v0 }
  0xee   : > { %846 = vst [vmem:[%s1283_s17 + $0x610] sm:$0xff] %v590_v7  ;;  %v622_v7 = vmul.f32 2.5, %v366_v2 }
  0xef   : > { %847 = vst [vmem:[%s1283_s17 + $0x618] sm:$0xff] %v591_v9  ;;  %v623_v9 = vmul.f32 2.5, %v367_v4 }
  0xf0   : > { %848 = vst [vmem:[%s1283_s17 + $0x620] sm:$0xff] %v592_v11  ;;  %v624_v11 = vmul.f32 2.5, %v368_v6 }
  0xf1   : > { %849 = vst [vmem:[%s1283_s17 + $0x628] sm:$0xff] %v593_v13  ;;  %v625_v13 = vmul.f32 2.5, %v369_v8 }
  0xf2   : > { %850 = vst [vmem:[%s1283_s17 + $0x630] sm:$0xff] %v594_v15  ;;  %v626_v15 = vmul.f32 2.5, %v370_v10 }
  0xf3   : > { %851 = vst [vmem:[%s1283_s17 + $0x638] sm:$0xff] %v595_v17  ;;  %v627_v17 = vmul.f32 2.5, %v371_v12 }
  0xf4   : > { %852 = vst [vmem:[%s1283_s17 + $0x640] sm:$0xff] %v596_v19  ;;  %v628_v19 = vmul.f32 2.5, %v372_v14 }
  0xf5   : > { %853 = vst [vmem:[%s1283_s17 + $0x648] sm:$0xff] %v597_v21  ;;  %v629_v21 = vmul.f32 2.5, %v373_v16 }
  0xf6   : > { %854 = vst [vmem:[%s1283_s17 + $0x650] sm:$0xff] %v598_v23  ;;  %v630_v23 = vmul.f32 2.5, %v374_v18 }
  0xf7   : > { %855 = vst [vmem:[%s1283_s17 + $0x658] sm:$0xff] %v599_v25  ;;  %v631_v25 = vmul.f32 2.5, %v375_v20 }
  0xf8   : > { %856 = vst [vmem:[%s1283_s17 + $0x660] sm:$0xff] %v600_v27  ;;  %v632_v27 = vmul.f32 2.5, %v376_v22 }
  0xf9   : > { %857 = vst [vmem:[%s1283_s17 + $0x668] sm:$0xff] %v601_v29  ;;  %v633_v29 = vmul.f32 2.5, %v377_v24 }
  0xfa   : > { %858 = vst [vmem:[%s1283_s17 + $0x670] sm:$0xff] %v602_v31  ;;  %v634_v31 = vmul.f32 2.5, %v378_v26 }
  0xfb   : > { %859 = vst [vmem:[%s1283_s17 + $0x678] sm:$0xff] %v603_v33  ;;  %v635_v33 = vmul.f32 2.5, %v379_v28 }
  0xfc   : > { %860 = vst [vmem:[%s1283_s17 + $0x680] sm:$0xff] %v604_v35  ;;  %v636_v35 = vmul.f32 2.5, %v380_v30 }
  0xfd   : > { %861 = vst [vmem:[%s1283_s17 + $0x688] sm:$0xff] %v605_v37  ;;  %v637_v37 = vmul.f32 2.5, %v381_v32 }
  0xfe   : > { %862 = vst [vmem:[%s1283_s17 + $0x690] sm:$0xff] %v606_v39  ;;  %v638_v39 = vmul.f32 2.5, %v382_v34 }
  0xff   : > { %863 = vst [vmem:[%s1283_s17 + $0x698] sm:$0xff] %v607_v41  ;;  %v639_v41 = vmul.f32 2.5, %v383_v36 }
 0x100   : > { %864 = vst [vmem:[%s1283_s17 + $0x6a0] sm:$0xff] %v608_v43  ;;  %v640_v43 = vmul.f32 2.5, %v384_v38 }
 0x101   : > { %865 = vst [vmem:[%s1283_s17 + $0x6a8] sm:$0xff] %v609_v45  ;;  %v641_v45 = vmul.f32 2.5, %v385_v40 }
 0x102   : > { %866 = vst [vmem:[%s1283_s17 + $0x6b0] sm:$0xff] %v610_v47  ;;  %v642_v47 = vmul.f32 2.5, %v386_v42 }
 0x103   : > { %867 = vst [vmem:[%s1283_s17 + $0x6b8] sm:$0xff] %v611_v49  ;;  %v643_v49 = vmul.f32 2.5, %v387_v44 }
 0x104   : > { %868 = vst [vmem:[%s1283_s17 + $0x6c0] sm:$0xff] %v612_v51  ;;  %v644_v51 = vmul.f32 2.5, %v388_v46 }
 0x105   : > { %869 = vst [vmem:[%s1283_s17 + $0x6c8] sm:$0xff] %v613_v53  ;;  %v645_v53 = vmul.f32 2.5, %v389_v48 }
 0x106   : > { %870 = vst [vmem:[%s1283_s17 + $0x6d0] sm:$0xff] %v614_v55  ;;  %v646_v55 = vmul.f32 2.5, %v390_v50 }
 0x107   : > { %871 = vst [vmem:[%s1283_s17 + $0x6d8] sm:$0xff] %v615_v57  ;;  %v647_v57 = vmul.f32 2.5, %v391_v52 }
 0x108   : > { %872 = vst [vmem:[%s1283_s17 + $0x6e0] sm:$0xff] %v616_v59  ;;  %v648_v59 = vmul.f32 2.5, %v392_v54 }
 0x109   : > { %873 = vst [vmem:[%s1283_s17 + $0x6e8] sm:$0xff] %v617_v61  ;;  %v649_v61 = vmul.f32 2.5, %v393_v56 }
 0x10a   : > { %874 = vst [vmem:[%s1283_s17 + $0x6f0] sm:$0xff] %v618_v63  ;;  %v651_v63 = vmul.f32 2.5, %v395_v60 }
 0x10b   : > { %875 = vst [vmem:[%s1283_s17 + $0x6f8] sm:$0xff] %v619_v1 }
 0x10c   : > { %876 = vst [vmem:[%s1283_s17 + $0x700] sm:$0xff] %v620_v3 }
 0x10d   : > { %877 = vst [vmem:[%s1283_s17 + $0x708] sm:$0xff] %v621_v5 }
 0x10e   : > { %878 = vst [vmem:[%s1283_s17 + $0x710] sm:$0xff] %v622_v7 }
 0x10f   : > { %879 = vst [vmem:[%s1283_s17 + $0x718] sm:$0xff] %v623_v9 }
 0x110   : > { %880 = vst [vmem:[%s1283_s17 + $0x720] sm:$0xff] %v624_v11 }
 0x111   : > { %881 = vst [vmem:[%s1283_s17 + $0x728] sm:$0xff] %v625_v13 }
 0x112   : > { %882 = vst [vmem:[%s1283_s17 + $0x730] sm:$0xff] %v626_v15 }
 0x113   : > { %883 = vst [vmem:[%s1283_s17 + $0x738] sm:$0xff] %v627_v17 }
 0x114   : > { %884 = vst [vmem:[%s1283_s17 + $0x740] sm:$0xff] %v628_v19 }
 0x115   : > { %885 = vst [vmem:[%s1283_s17 + $0x748] sm:$0xff] %v629_v21 }
 0x116   : > { %886 = vst [vmem:[%s1283_s17 + $0x750] sm:$0xff] %v630_v23 }
 0x117   : > { %887 = vst [vmem:[%s1283_s17 + $0x758] sm:$0xff] %v631_v25 }
 0x118   : > { %888 = vst [vmem:[%s1283_s17 + $0x760] sm:$0xff] %v632_v27 }
 0x119   : > { %889 = vst [vmem:[%s1283_s17 + $0x768] sm:$0xff] %v633_v29 }
 0x11a   : > { %890 = vst [vmem:[%s1283_s17 + $0x770] sm:$0xff] %v634_v31 }
 0x11b   : > { %891 = vst [vmem:[%s1283_s17 + $0x778] sm:$0xff] %v635_v33 }
 0x11c   : > { %892 = vst [vmem:[%s1283_s17 + $0x780] sm:$0xff] %v636_v35 }
 0x11d   : > { %893 = vst [vmem:[%s1283_s17 + $0x788] sm:$0xff] %v637_v37 }
 0x11e   : > { %894 = vst [vmem:[%s1283_s17 + $0x790] sm:$0xff] %v638_v39 }
 0x11f   : > { %895 = vst [vmem:[%s1283_s17 + $0x798] sm:$0xff] %v639_v41 }
 0x120   : > { %896 = vst [vmem:[%s1283_s17 + $0x7a0] sm:$0xff] %v640_v43 }
 0x121   : > { %897 = vst [vmem:[%s1283_s17 + $0x7a8] sm:$0xff] %v641_v45 }
 0x122   : > { %898 = vst [vmem:[%s1283_s17 + $0x7b0] sm:$0xff] %v642_v47 }
 0x123   : > { %899 = vst [vmem:[%s1283_s17 + $0x7b8] sm:$0xff] %v643_v49 }
 0x124   : > { %900 = vst [vmem:[%s1283_s17 + $0x7c0] sm:$0xff] %v644_v51 }
 0x125   : > { %901 = vst [vmem:[%s1283_s17 + $0x7c8] sm:$0xff] %v645_v53 }
 0x126   : > { %902 = vst [vmem:[%s1283_s17 + $0x7d0] sm:$0xff] %v646_v55 }
 0x127   : > { %903 = vst [vmem:[%s1283_s17 + $0x7d8] sm:$0xff] %v647_v57 }
 0x128   : > { %904 = vst [vmem:[%s1283_s17 + $0x7e0] sm:$0xff] %v648_v59 }
 0x129   : > { %905 = vst [vmem:[%s1283_s17 + $0x7e8] sm:$0xff] %v649_v61 }
 0x12a   : > { %906 = vst [vmem:[%s1283_s17 + $0x7f0] sm:$0xff] %v650_v62 }
 0x12b   : > { %907 = vst [vmem:[%s1283_s17 + $0x7f8] sm:$0xff] %v651_v63 }
 0x12c   : > { %1125 = shalt.err (!%p1122_p4)
}
 0x12d   : > { %s1168_s16 = smov 8192   ;;  %s1169_s20 = smov 512  }
 0x12e   : > { %1020 = dma.vmem_to_hbm [thread:$0]  (%p1230_p11), %s923_s10, 32768, %s925_s29, %s909_s30, %s1168_s16, %s1168_s16, %s1169_s20  }
 0x12f PF: > { %s939_s21 = sand.u32 1, %s1152_s6   ;;  %p1831_p7 = scmp.ge.s32.totalorder %s1164_s9, 2 }
 0x130   : > { %s940_s22 = scalar_lea.sflag [#allocation4], %s939_s21 }
 0x131   : > { %p1027_p5 = pnand %p1831_p7, %p1234_p12 }
 0x133   : > { %p1028_p8 = pneg %p1027_p5 }
 0x135   : > { %1147 = dma.done.wait (%p1028_p8), %s940_s22, 32768  }
 0x136   : > { %1149 = vsyncadd (%p1028_p8), %s940_s22, 4294934528  ;;  %p14_p10 = scmp.ge.s32.totalorder %s1205_s12, 4   ;;  %s1832_s6 = smov %s1156_s7 }
 0x137   : > { %s1833_s7 = smov %s1160_s8  ;;  %s1834_s8 = smov %s1217_s15 }
 0x138   : > { %s1835_s9 = smov %s1205_s12  ;;  %16 = sbr.rel (!%p14_p10) target bundleno = 5 (0x5), region = 69 }
 0x13d   :  { %946 = vsyncpa [#allocation3], 1 }
 0x13e   :  { %948 = vsyncpa [#allocation3 + $0x1], 1 }
 0x13f   :  { %949 = vsyncpa [#allocation4], 1 }
 0x140   :  { %951 = vsyncpa [#allocation4 + $0x1], 1 }

</bundles_post_ra>
